<compile_context>
chip_gen: v6e
topology: v6e:2x2x1
jax: 0.10.0
libtpu: 0.0.40
codegen_flags: <defaults>
</compile_context>

<pallas_src>
import functools

import jax
import jax.numpy as jnp
from jax import lax
from jax.experimental import pallas as pl
from jax.experimental.pallas import tpu as pltpu


def _round_up(x, m):
    return (x + m - 1) // m * m


def _build_layer1_matrix(W1, W, C, F, K1):
    """Stacked block-Toeplitz matrix for the 3x3 conv, shape (K1, W*F).

    Row index = ky*WC + wp*C + c  (WC = (W+2)*C, wp = padded w position),
    col index = w*F + f.  M[ky*WC + wp*C + c, w*F+f] = W1[f, c, ky, wp-w] for
    0 <= wp-w <= 2, else 0; rows are zero-padded up to K1."""
    WC = (W + 2) * C
    w1t = jnp.transpose(W1, (2, 3, 1, 0))                 # (3, 3, C, F) [ky, kx, c, f]
    wp = jnp.arange(W + 2)[:, None]
    wo = jnp.arange(W)[None, :]
    kx = wp - wo                                          # (W+2, W)
    valid = ((kx >= 0) & (kx <= 2)).astype(W1.dtype)
    kxc = jnp.clip(kx, 0, 2)
    m = w1t[:, kxc] * valid[None, :, :, None, None]       # (3, W+2, W, C, F)
    m = jnp.transpose(m, (0, 1, 3, 2, 4)).reshape(3 * WC, W * F)
    return jnp.pad(m, ((0, K1 - 3 * WC), (0, 0)))


def _build_layer2_matrices(W2, W, F):
    """Sub-pixel decomposition of ConvTranspose2d(F, F, 4, stride=2, padding=1),
    with the two vertical taps (a=0/1) stacked along the contraction.

    Output phase (pi, pj):  y2[2i+pi, 2j+pj, fo] =
        sum_{a,b in {0,1}, fi} y1[i-1+pi+a, j-1+pj+b, fi] * W2[fi, fo, 3-pi-2a, 3-pj-2b]
    (out-of-range y1 rows contribute 0; the w-boundary is folded into the matrices).

    Returns (2, 2, 2*W*F, W*F) indexed [pi, pj]; rows 0:WF = a=0 block, WF:2WF = a=1."""
    WF = W * F
    iw = jnp.arange(W)[:, None]
    jj = jnp.arange(W)[None, :]
    blocks = []
    for pi in range(2):
        for pj in range(2):
            b = iw - jj + 1 - pj                          # (W, W)
            valid = ((b >= 0) & (b <= 1)).astype(W2.dtype)
            kw = 3 - pj - 2 * jnp.clip(b, 0, 1)           # (W, W)
            sub = []
            for a in range(2):
                kh = 3 - pi - 2 * a
                blk = W2[:, :, kh, :][:, :, kw]           # (F, F, W, W) [fi, fo, iw, j]
                blk = blk * valid[None, None, :, :]
                blk = jnp.transpose(blk, (2, 0, 3, 1)).reshape(WF, WF)
                sub.append(blk)
            blocks.append(jnp.concatenate(sub, axis=0))   # (2*WF, WF)
    return jnp.stack(blocks).reshape(2, 2, 2 * WF, WF)


def make_dcnn_params(W1, b1, W2, b2, H, W, C, F, *, compute_dtype=jnp.bfloat16):
    """Precompute the structured weight matrices ONCE (not per forward call)."""
    WF = W * F
    WC = (W + 2) * C
    K1 = _round_up(3 * WC, 128)
    M1s = _build_layer1_matrix(W1, W, C, F, K1).astype(compute_dtype)     # (K1, WF)
    M2s = _build_layer2_matrices(W2, W, F).astype(compute_dtype)          # (2,2,2WF,WF)
    b1v = jnp.tile(b1, W).reshape(1, WF).astype(jnp.float32)
    b2v = jnp.tile(b2, W).reshape(1, WF).astype(jnp.float32)
    return M1s, b1v, M2s, b2v


def _fused_dcnn_kernel(NHp, H, WF, lhs1_ref, m1_ref, b1_ref, m2_ref, b2_ref,
                       o_ref, y1p_ref):
    pi = pl.program_id(0)                                  # output-row phase (grid axis)

    # ------------- layer 1 : 3x3 conv + bias + ReLU as ONE K=256 matmul -------------
    y1 = jnp.dot(lhs1_ref[...], m1_ref[...], preferred_element_type=jnp.float32)
    y1 = jnp.maximum(y1 + b1_ref[...], 0.0)                # (NHp, WF) f32 epilogue

    # y1 stays resident in VMEM (f32); bulk store starts on an 8-row boundary.
    y1p_ref[8:8 + NHp, :] = y1

    # ------- layer 2 : 4x4 stride-2 transpose conv, phase pi, K=2*WF matmuls -------
    # Output row r of phase pi needs y1 rows (r+pi-1, r+pi); stack both vertical taps
    # along lanes so each pj phase is a single (NHp, 256) x (256, 128) matmul.
    lo_raw = y1p_ref[pl.ds(7 + pi, NHp), :]                # y1[r + pi - 1]
    hi_raw = y1p_ref[pl.ds(8 + pi, NHp), :]                # y1[r + pi]

    # Per-image vertical halo: zero the taps that would cross an image boundary
    # (also kills the uninitialized halo rows of the scratch).
    rmod = lax.broadcasted_iota(jnp.int32, (NHp, WF), 0) % H
    lo = jnp.where(jnp.logical_and(pi == 0, rmod == 0), 0.0, lo_raw)
    hi = jnp.where(jnp.logical_and(pi == 1, rmod == H - 1), 0.0, hi_raw)

    lhs2 = jnp.concatenate([lo, hi], axis=1).astype(m2_ref.dtype)   # (NHp, 2*WF)

    for pj in range(2):
        acc = jnp.dot(lhs2, m2_ref[0, pj], preferred_element_type=jnp.float32)
        o_ref[0, pj] = jnp.maximum(acc + b2_ref[...], 0.0).astype(o_ref.dtype)


def dcnn_layer_forward(x_nchw, params):
    """Matches DCNN_layer.forward (minus the debug prints): NCHW in, NCHW out."""
    M1s, b1v, M2s, b2v = params
    N, C, H, Wd = x_nchw.shape
    WF = M1s.shape[1]
    F = WF // Wd
    WC = (Wd + 2) * C
    K1 = M1s.shape[0]
    NH = N * H
    NHp = _round_up(NH, 8)
    cdt = M1s.dtype

    # im2row over ky (batch folded into rows): lhs1[n*H+h, ky*WC + wp*C + c]
    #   = x_padded[n, h+ky, wp, c]; lane-padded so K = K1 (= 256 here).
    x = jnp.transpose(x_nchw, (0, 2, 3, 1))                         # NHWC
    xp = jnp.pad(x, ((0, 0), (1, 1), (1, 1), (0, 0))).reshape(N, H + 2, WC)
    lhs1 = jnp.concatenate([xp[:, 0:H], xp[:, 1:H + 1], xp[:, 2:H + 2]], axis=-1)
    lhs1 = lhs1.reshape(NH, 3 * WC)
    lhs1 = jnp.pad(lhs1, ((0, NHp - NH), (0, K1 - 3 * WC))).astype(cdt)

    kernel = functools.partial(_fused_dcnn_kernel, NHp, H, WF)

    out = pl.pallas_call(
        kernel,
        out_shape=jax.ShapeDtypeStruct((2, 2, NHp, WF), jnp.float32),
        grid=(2,),                                                  # one step per pi phase
        in_specs=[
            pl.BlockSpec((NHp, K1), lambda pi: (0, 0)),             # im2row'd input
            pl.BlockSpec((K1, WF), lambda pi: (0, 0)),              # layer-1 matrix
            pl.BlockSpec((1, WF), lambda pi: (0, 0)),               # layer-1 bias
            pl.BlockSpec((1, 2, 2 * WF, WF), lambda pi: (pi, 0, 0, 0)),  # layer-2 matrices
            pl.BlockSpec((1, WF), lambda pi: (0, 0)),               # layer-2 bias
        ],
        out_specs=pl.BlockSpec((1, 2, NHp, WF), lambda pi: (pi, 0, 0, 0)),
        scratch_shapes=[pltpu.VMEM((NHp + 16, WF), jnp.float32)],   # resident y1 (+halo)
        compiler_params=pltpu.CompilerParams(
            dimension_semantics=("parallel",),                      # 2 TCs on v7x
            vmem_limit_bytes=32 * 1024 * 1024),
    )(lhs1, M1s, b1v, M2s, b2v)

    # (pi, pj, n*H+h, w*F+f) -> NCHW (N, F, 2H, 2W): interleave the 4 phases.
    out = out[:, :, :NH]
    y2 = out.reshape(2, 2, N, H, Wd, F)
    y2 = jnp.transpose(y2, (2, 5, 3, 0, 4, 1)).reshape(N, F, 2 * H, 2 * Wd)
    return y2


def _reference_forward(x_nchw, W1, b1, W2, b2):
    """Pure-JAX reference (lax.conv_general_dilated) for correctness check."""
    dn = ('NCHW', 'OIHW', 'NCHW')
    y1 = lax.conv_general_dilated(x_nchw, W1, (1, 1), ((1, 1), (1, 1)),
                                  dimension_numbers=dn)
    y1 = jnp.maximum(y1 + b1.reshape(1, -1, 1, 1), 0.0)
    W2c = jnp.transpose(W2, (1, 0, 2, 3))[:, :, ::-1, ::-1]
    y2 = lax.conv_general_dilated(y1, W2c, (1, 1), ((2, 2), (2, 2)),
                                  lhs_dilation=(2, 2), dimension_numbers=dn)
    y2 = jnp.maximum(y2 + b2.reshape(1, -1, 1, 1), 0.0)
    return y2


if __name__ == "__main__":
    # DCNN_layer(h=16, c=4, f=8); input is NCHW (batch=2, c=4, 16, 16)
    N, C, H, F = 2, 4, 16, 8

    key = jax.random.PRNGKey(0)
    k1, k2, k3, k4, k5 = jax.random.split(key, 5)
    W1 = jax.random.normal(k1, (F, C, 3, 3), jnp.float32) * 0.1   # Conv2d.weight
    b1 = jax.random.normal(k2, (F,), jnp.float32) * 0.1           # Conv2d.bias
    W2 = jax.random.normal(k3, (F, F, 4, 4), jnp.float32) * 0.1   # ConvT.weight
    b2 = jax.random.normal(k4, (F,), jnp.float32) * 0.1           # ConvT.bias
    x = jax.random.normal(k5, (N, C, H, H), jnp.float32)

    ref = _reference_forward(x, W1, b1, W2, b2)
    fwd = jax.jit(dcnn_layer_forward)

    # f32 matmul operands: exact check against the lax reference.
    params_f32 = make_dcnn_params(W1, b1, W2, b2, H, H, C, F,
                                  compute_dtype=jnp.float32)
    out = jax.block_until_ready(fwd(x, params_f32))
    assert out.shape == (N, F, 2 * H, 2 * H), out.shape
    assert jnp.allclose(out, ref, atol=1e-4, rtol=1e-4), \
        float(jnp.max(jnp.abs(out - ref)))

    # bf16 matmul operands (recommended fast path on v5e/v6e/v7x), f32 accumulation.
    params_bf16 = make_dcnn_params(W1, b1, W2, b2, H, H, C, F,
                                   compute_dtype=jnp.bfloat16)
    out_bf16 = jax.block_until_ready(fwd(x, params_bf16))
    assert jnp.allclose(out_bf16, ref, atol=5e-2, rtol=5e-2), \
        float(jnp.max(jnp.abs(out_bf16 - ref)))

    # TODO(synk): the `print(x.shape)` debug statements in forward() are omitted.
    print("KERNEL_OK")
</pallas_src>

<mosaic_0001>
module attributes {stable_mosaic.version = 11 : i64} {
  func.func @_fused_dcnn_kernel(%arg0: i32, %arg1: memref<32x256xf32, #tpu.memory_space<vmem>>, %arg2: memref<256x128xf32, #tpu.memory_space<vmem>>, %arg3: memref<1x128xf32, #tpu.memory_space<vmem>>, %arg4: memref<1x2x256x128xf32, #tpu.memory_space<vmem>>, %arg5: memref<1x128xf32, #tpu.memory_space<vmem>>, %arg6: memref<1x2x32x128xf32, #tpu.memory_space<vmem>>, %arg7: memref<48x128xf32, #tpu.memory_space<vmem>>) attributes {dimension_semantics = [#tpu.dimension_semantics<parallel>], iteration_bounds = array<i64: 2>, scalar_prefetch = 0 : i64, scratch_operands = 1 : i64, tpu.core_type = #tpu.core_type<tc>, window_params = [{pipeline_mode = #tpu.pipeline_mode<synchronous>, transform_indices = @transform_0, window_bounds = array<i64: 32, 256>}, {pipeline_mode = #tpu.pipeline_mode<synchronous>, transform_indices = @transform_1, window_bounds = array<i64: 256, 128>}, {pipeline_mode = #tpu.pipeline_mode<synchronous>, transform_indices = @transform_2, window_bounds = array<i64: 1, 128>}, {transform_indices = @transform_3, window_bounds = array<i64: 1, 2, 256, 128>}, {pipeline_mode = #tpu.pipeline_mode<synchronous>, transform_indices = @transform_4, window_bounds = array<i64: 1, 128>}, {transform_indices = @transform_5, window_bounds = array<i64: 1, 2, 32, 128>}]} {
    %c0 = arith.constant 0 : index
    %c0_0 = arith.constant 0 : index
    %0 = vector.load %arg1[%c0, %c0_0] : memref<32x256xf32, #tpu.memory_space<vmem>>, vector<32x256xf32>
    %c0_1 = arith.constant 0 : index
    %c0_2 = arith.constant 0 : index
    %1 = vector.load %arg2[%c0_1, %c0_2] : memref<256x128xf32, #tpu.memory_space<vmem>>, vector<256x128xf32>
    %cst = arith.constant dense<0.000000e+00> : vector<32x128xf32>
    %2 = tpu.matmul %0, %1, %cst {dimension_numbers = #tpu.dot_dimension_numbers<[1], [0], [0], [1], [0, 0, 1, 1], [], []>} : vector<32x256xf32>, vector<256x128xf32>, vector<32x128xf32> -> vector<32x128xf32>
    %c0_3 = arith.constant 0 : index
    %c0_4 = arith.constant 0 : index
    %3 = vector.load %arg3[%c0_3, %c0_4] : memref<1x128xf32, #tpu.memory_space<vmem>>, vector<1x128xf32>
    %4 = vector.broadcast %3 : vector<1x128xf32> to vector<32x128xf32>
    %5 = arith.addf %2, %4 : vector<32x128xf32>
    %cst_5 = arith.constant 0.000000e+00 : f32
    %6 = vector.broadcast %cst_5 : f32 to vector<32x128xf32>
    %7 = arith.maximumf %5, %6 : vector<32x128xf32>
    %c8 = arith.constant 8 : index
    %c0_6 = arith.constant 0 : index
    %8 = vector.load %arg7[%c8, %c0_6] : memref<48x128xf32, #tpu.memory_space<vmem>>, vector<32x128xf32>
    tpu.vector_store %arg7[%c8, %c0_6], %7 {strides = array<i32>} : memref<48x128xf32, #tpu.memory_space<vmem>>, vector<32x128xf32>,
    %c7_i32 = arith.constant 7 : i32
    %9 = arith.addi %c7_i32, %arg0 : i32
    %10 = arith.index_cast %9 : i32 to index
    %c0_7 = arith.constant 0 : index
    %11 = vector.load %arg7[%10, %c0_7] : memref<48x128xf32, #tpu.memory_space<vmem>>, vector<32x128xf32>
    %c8_i32 = arith.constant 8 : i32
    %12 = arith.addi %c8_i32, %arg0 : i32
    %13 = arith.index_cast %12 : i32 to index
    %c0_8 = arith.constant 0 : index
    %14 = vector.load %arg7[%13, %c0_8] : memref<48x128xf32, #tpu.memory_space<vmem>>, vector<32x128xf32>
    %15 = tpu.iota {dimensions = array<i32: 0>} : vector<32x128xi32>
    %c16_i32 = arith.constant 16 : i32
    %c0_i32 = arith.constant 0 : i32
    %16 = arith.cmpi eq, %c16_i32, %c0_i32 : i32
    %c1_i32 = arith.constant 1 : i32
    %17 = arith.select %16, %c1_i32, %c16_i32 : i32
    %18 = vector.broadcast %17 : i32 to vector<32x128xi32>
    %19 = arith.remsi %15, %18 : vector<32x128xi32>
    %c0_i32_9 = arith.constant 0 : i32
    %20 = vector.broadcast %c0_i32_9 : i32 to vector<32x128xi32>
    %21 = arith.cmpi ne, %19, %20 : vector<32x128xi32>
    %c0_i32_10 = arith.constant 0 : i32
    %22 = vector.broadcast %c0_i32_10 : i32 to vector<32x128xi32>
    %23 = arith.cmpi slt, %19, %22 : vector<32x128xi32>
    %c0_i32_11 = arith.constant 0 : i32
    %24 = arith.cmpi slt, %17, %c0_i32_11 : i32
    %25 = vector.broadcast %24 : i1 to vector<32x128xi1>
    %26 = vector.broadcast %25 : vector<32x128xi1> to vector<32x128xi1>
    %27 = arith.xori %23, %26 : vector<32x128xi1>
    %28 = arith.andi %27, %21 : vector<32x128xi1>
    %29 = vector.broadcast %17 : i32 to vector<32x128xi32>
    %30 = arith.addi %19, %29 : vector<32x128xi32>
    %31 = arith.select %28, %30, %19 : vector<32x128xi1>, vector<32x128xi32>
    %c0_i32_12 = arith.constant 0 : i32
    %32 = arith.cmpi eq, %arg0, %c0_i32_12 : i32
    %c0_i32_13 = arith.constant 0 : i32
    %33 = vector.broadcast %c0_i32_13 : i32 to vector<32x128xi32>
    %34 = arith.cmpi eq, %31, %33 : vector<32x128xi32>
    %35 = vector.broadcast %32 : i1 to vector<32x128xi1>
    %36 = arith.andi %35, %34 : vector<32x128xi1>
    %cst_14 = arith.constant 0.000000e+00 : f32
    %37 = vector.broadcast %cst_14 : f32 to vector<32x128xf32>
    %38 = arith.select %36, %37, %11 : vector<32x128xi1>, vector<32x128xf32>
    %c1_i32_15 = arith.constant 1 : i32
    %39 = arith.cmpi eq, %arg0, %c1_i32_15 : i32
    %c15_i32 = arith.constant 15 : i32
    %40 = vector.broadcast %c15_i32 : i32 to vector<32x128xi32>
    %41 = arith.cmpi eq, %31, %40 : vector<32x128xi32>
    %42 = vector.broadcast %39 : i1 to vector<32x128xi1>
    %43 = arith.andi %42, %41 : vector<32x128xi1>
    %cst_16 = arith.constant 0.000000e+00 : f32
    %44 = vector.broadcast %cst_16 : f32 to vector<32x128xf32>
    %45 = arith.select %43, %44, %14 : vector<32x128xi1>, vector<32x128xf32>
    %46 = tpu.concatenate %38, %45 in 1 : vector<32x128xf32>, vector<32x128xf32> -> vector<32x256xf32>
    %c0_17 = arith.constant 0 : index
    %c0_18 = arith.constant 0 : index
    %c0_19 = arith.constant 0 : index
    %c0_20 = arith.constant 0 : index
    %47 = vector.load %arg4[%c0_17, %c0_18, %c0_19, %c0_20] : memref<1x2x256x128xf32, #tpu.memory_space<vmem>>, vector<1x1x256x128xf32>
    %48 = vector.shape_cast %47 : vector<1x1x256x128xf32> to vector<256x128xf32>
    %cst_21 = arith.constant dense<0.000000e+00> : vector<32x128xf32>
    %49 = tpu.matmul %46, %48, %cst_21 {dimension_numbers = #tpu.dot_dimension_numbers<[1], [0], [0], [1], [0, 0, 1, 1], [], []>} : vector<32x256xf32>, vector<256x128xf32>, vector<32x128xf32> -> vector<32x128xf32>
    %c0_22 = arith.constant 0 : index
    %c0_23 = arith.constant 0 : index
    %50 = vector.load %arg5[%c0_22, %c0_23] : memref<1x128xf32, #tpu.memory_space<vmem>>, vector<1x128xf32>
    %51 = vector.broadcast %50 : vector<1x128xf32> to vector<32x128xf32>
    %52 = arith.addf %49, %51 : vector<32x128xf32>
    %cst_24 = arith.constant 0.000000e+00 : f32
    %53 = vector.broadcast %cst_24 : f32 to vector<32x128xf32>
    %54 = arith.maximumf %52, %53 : vector<32x128xf32>
    %c0_25 = arith.constant 0 : index
    %c0_26 = arith.constant 0 : index
    %c0_27 = arith.constant 0 : index
    %c0_28 = arith.constant 0 : index
    %55 = vector.load %arg6[%c0_25, %c0_26, %c0_27, %c0_28] : memref<1x2x32x128xf32, #tpu.memory_space<vmem>>, vector<1x1x32x128xf32>
    %56 = vector.shape_cast %55 : vector<1x1x32x128xf32> to vector<32x128xf32>
    %57 = vector.shape_cast %54 : vector<32x128xf32> to vector<1x1x32x128xf32>
    tpu.vector_store %arg6[%c0_25, %c0_26, %c0_27, %c0_28], %57 {strides = array<i32>} : memref<1x2x32x128xf32, #tpu.memory_space<vmem>>, vector<1x1x32x128xf32>,
    %c0_29 = arith.constant 0 : index
    %c1 = arith.constant 1 : index
    %c0_30 = arith.constant 0 : index
    %c0_31 = arith.constant 0 : index
    %58 = vector.load %arg4[%c0_29, %c1, %c0_30, %c0_31] : memref<1x2x256x128xf32, #tpu.memory_space<vmem>>, vector<1x1x256x128xf32>
    %59 = vector.shape_cast %58 : vector<1x1x256x128xf32> to vector<256x128xf32>
    %cst_32 = arith.constant dense<0.000000e+00> : vector<32x128xf32>
    %60 = tpu.matmul %46, %59, %cst_32 {dimension_numbers = #tpu.dot_dimension_numbers<[1], [0], [0], [1], [0, 0, 1, 1], [], []>} : vector<32x256xf32>, vector<256x128xf32>, vector<32x128xf32> -> vector<32x128xf32>
    %c0_33 = arith.constant 0 : index
    %c0_34 = arith.constant 0 : index
    %61 = vector.load %arg5[%c0_33, %c0_34] : memref<1x128xf32, #tpu.memory_space<vmem>>, vector<1x128xf32>
    %62 = vector.broadcast %61 : vector<1x128xf32> to vector<32x128xf32>
    %63 = arith.addf %60, %62 : vector<32x128xf32>
    %cst_35 = arith.constant 0.000000e+00 : f32
    %64 = vector.broadcast %cst_35 : f32 to vector<32x128xf32>
    %65 = arith.maximumf %63, %64 : vector<32x128xf32>
    %c0_36 = arith.constant 0 : index
    %c1_37 = arith.constant 1 : index
    %c0_38 = arith.constant 0 : index
    %c0_39 = arith.constant 0 : index
    %66 = vector.load %arg6[%c0_36, %c1_37, %c0_38, %c0_39] : memref<1x2x32x128xf32, #tpu.memory_space<vmem>>, vector<1x1x32x128xf32>
    %67 = vector.shape_cast %66 : vector<1x1x32x128xf32> to vector<32x128xf32>
    %68 = vector.shape_cast %65 : vector<32x128xf32> to vector<1x1x32x128xf32>
    tpu.vector_store %arg6[%c0_36, %c1_37, %c0_38, %c0_39], %68 {strides = array<i32>} : memref<1x2x32x128xf32, #tpu.memory_space<vmem>>, vector<1x1x32x128xf32>,
    return
  }
  func.func @transform_0(%arg0: i32) -> (i32, i32) {
    %c0_i32 = arith.constant 0 : i32
    %c0_i32_0 = arith.constant 0 : i32
    %c0_i32_1 = arith.constant 0 : i32
    return %c0_i32, %c0_i32_0 : i32, i32
  }
  func.func @transform_1(%arg0: i32) -> (i32, i32) {
    %c0_i32 = arith.constant 0 : i32
    %c0_i32_0 = arith.constant 0 : i32
    %c0_i32_1 = arith.constant 0 : i32
    return %c0_i32, %c0_i32_0 : i32, i32
  }
  func.func @transform_2(%arg0: i32) -> (i32, i32) {
    %c0_i32 = arith.constant 0 : i32
    %c0_i32_0 = arith.constant 0 : i32
    %c0_i32_1 = arith.constant 0 : i32
    return %c0_i32, %c0_i32_0 : i32, i32
  }
  func.func @transform_3(%arg0: i32) -> (i32, i32, i32, i32) {
    %c0_i32 = arith.constant 0 : i32
    %c0_i32_0 = arith.constant 0 : i32
    %c0_i32_1 = arith.constant 0 : i32
    %c0_i32_2 = arith.constant 0 : i32
    return %arg0, %c0_i32, %c0_i32_0, %c0_i32_1 : i32, i32, i32, i32
  }
  func.func @transform_4(%arg0: i32) -> (i32, i32) {
    %c0_i32 = arith.constant 0 : i32
    %c0_i32_0 = arith.constant 0 : i32
    %c0_i32_1 = arith.constant 0 : i32
    return %c0_i32, %c0_i32_0 : i32, i32
  }
  func.func @transform_5(%arg0: i32) -> (i32, i32, i32, i32) {
    %c0_i32 = arith.constant 0 : i32
    %c0_i32_0 = arith.constant 0 : i32
    %c0_i32_1 = arith.constant 0 : i32
    %c0_i32_2 = arith.constant 0 : i32
    return %arg0, %c0_i32, %c0_i32_0, %c0_i32_1 : i32, i32, i32, i32
  }
}

</mosaic_0001>

<bundles_post_ra>
// kernel: dcnn_layer_forward.1
= control target key start
LH: loop header
LB: loop body
LE: loop exit
PB: predicated region body
PF: predicated region fallthrough
CT: control target
= control target key end

     0   :  { %s1089_s18 = smov 0   ;;  %s1501_s0 = inlined_call_operand.vmem [shape: f32[32,256], index: 0, kind: input, shape index: {}]   ;;  %s1502_s1 = inlined_call_operand.vmem [shape: f32[256,128], index: 1, kind: input, shape index: {}]   ;;  %s1503_s2 = inlined_call_operand.vmem [shape: f32[1,128], index: 2, kind: input, shape index: {}]   ;;  %s1504_s3 = inlined_call_operand.vmem [shape: f32[2,2,256,128], index: 3, kind: input, shape index: {}]   ;;  %s1505_s4 = inlined_call_operand.vmem [shape: f32[1,128], index: 4, kind: input, shape index: {}]   ;;  %s1506_s5 = inlined_call_operand.vmem [shape: f32[2,2,32,128], index: 5, kind: output, shape index: {}]  }
   0x1 LB: > { %s1095_s19 = sadd.s32 4294967295, %s1057_s18   ;;  %p791_p0 = scmp.ge.s32.totalorder %s1057_s18, 1  ;;  %s1057_s18 = sphi %s1089_s18, %s15_s18  }
   0x2   : > { %p187_p1 = scmp.lt.s32.totalorder %s1057_s18, 3 }
   0x4   : > { %p188_p2 = pnand %p791_p0, %p187_p1 }
   0x5   : > { %p215_p3 = scmp.lt.s32.totalorder (!%p188_p2), %s1095_s19, 1  ;;  %p430_p4 = scmp.eq.s32.totalorder (!%p188_p2), %s1095_s19, 0 }
   0x6   : > { %191 = sbr.rel (%p188_p2) target bundleno = 504 (0x1f8), region = 40  ;;  %p446_p5 = scmp.eq.s32.totalorder (!%p188_p2), %s1095_s19, 1 }
   0xb   : > { %v264_v0 = vld [vmem:[%s1502_s1 + $0xf8] sm:$0xff]  ;;  %v263_v2 = vld [vmem:[%s1502_s1 + $0xf0] sm:$0xff]  ;;  %v262_v4 = vld [vmem:[%s1502_s1 + $0xe8] sm:$0xff]  ;;  %s1119_s7 = scalar_select %p215_p3, %s1095_s19, 1 }
   0xc   : > { %v248_v1 = vld [vmem:[%s1502_s1 + $0x78] sm:$0xff]  ;;  %879 = vmatprep.subr.mxu0 %v264_v0  ;;  %v247_v3 = vld [vmem:[%s1502_s1 + $0x70] sm:$0xff]  ;;  %v246_v5 = vld [vmem:[%s1502_s1 + $0x68] sm:$0xff]  ;;  %s451_s20 = scalar_select %p446_p5, 1, 0 }
   0xd   : > { %880 = vmatpush3.msra.mxu0 %v248_v1  ;;  %v261_v6 = vld [vmem:[%s1502_s1 + $0xe0] sm:$0xff]  ;;  %v260_v8 = vld [vmem:[%s1502_s1 + $0xd8] sm:$0xff]  ;;  %s863_s16 = sshll.u32 %s1119_s7, 9  ;;  %v259_v10 = vld [vmem:[%s1502_s1 + $0xd0] sm:$0xff]  ;;  %s1408_s19 = scalar_lea.vmem [#allocation2], %s1057_s18 }
   0xe   : > { %881 = vmatprep.subr.mxu0 %v263_v2  ;;  %v245_v7 = vld [vmem:[%s1502_s1 + $0x60] sm:$0xff]  ;;  %v244_v9 = vld [vmem:[%s1502_s1 + $0x58] sm:$0xff]  ;;  %v243_v11 = vld [vmem:[%s1502_s1 + $0x50] sm:$0xff]  ;;  %s1149_s29 = scalar_lea.vmem %s1504_s3, %s863_s16  ;;  %s864_s23 = sshll.u32 %s1119_s7, 6 }
   0xf   : > { %882 = vmatpush3.msra.mxu0 %v247_v3  ;;  %v258_v12 = vld [vmem:[%s1502_s1 + $0xc8] sm:$0xff]  ;;  %v257_v15 = vld [vmem:[%s1502_s1 + $0xc0] sm:$0xff]  ;;  %v493_v17 = vld [vmem:[%s1149_s29 + $0xf8] sm:$0xff]  ;;  %s1488_s26 = scalar_lea.vmem %s1506_s5, %s864_s23 }
  0x10   : > { %883 = vmatprep.subr.mxu0 %v262_v4  ;;  %v226_v13 = vld [vmem:[%s1501_s0 + $0x8] sm:$0xff]  ;;  %v241_v16 = vld [vmem:[%s1502_s1 + $0x40] sm:$0xff]  ;;  %v477_v18 = vld [vmem:[%s1149_s29 + $0x78] sm:$0xff]  ;;  %923 = vmatprep.subr.mxu1 %v493_v17 }
  0x11   : > { %884 = vmatpush3.msra.mxu0 %v246_v5  ;;  %v242_v14 = vld [vmem:[%s1502_s1 + $0x48] sm:$0xff]  ;;  %336 = vmatprep.mubr.f32.mxu0 %v226_v13  ;;  %v256_v19 = vld [vmem:[%s1502_s1 + $0xb8] sm:$0xff]  ;;  %v492_v20 = vld [vmem:[%s1149_s29 + $0xf0] sm:$0xff] }
  0x12   : > { %885 = vmatprep.subr.mxu0 %v261_v6  ;;  %v240_v21 = vld [vmem:[%s1502_s1 + $0x38] sm:$0xff]  ;;  %924 = vmatpush3.msra.mxu1 %v477_v18  ;;  %v255_v22 = vld [vmem:[%s1502_s1 + $0xb0] sm:$0xff]  ;;  %v254_v24 = vld [vmem:[%s1502_s1 + $0xa8] sm:$0xff] }
  0x13   : > { %886 = vmatpush3.msra.mxu0 %v245_v7  ;;  %925 = vmatprep.subr.mxu1 %v492_v20  ;;  %v239_v23 = vld [vmem:[%s1502_s1 + $0x30] sm:$0xff]  ;;  %v238_v25 = vld [vmem:[%s1502_s1 + $0x28] sm:$0xff]  ;;  %v253_v26 = vld [vmem:[%s1502_s1 + $0xa0] sm:$0xff] }
  0x14   : > { %887 = vmatprep.subr.mxu0 %v260_v8  ;;  %v237_v27 = vld [vmem:[%s1502_s1 + $0x20] sm:$0xff]  ;;  %v252_v28 = vld [vmem:[%s1502_s1 + $0x98] sm:$0xff]  ;;  %v251_v30 = vld [vmem:[%s1502_s1 + $0x90] sm:$0xff] }
  0x15   : > { %888 = vmatpush3.msra.mxu0 %v244_v9  ;;  %v236_v29 = vld [vmem:[%s1502_s1 + $0x18] sm:$0xff]  ;;  %v235_v31 = vld [vmem:[%s1502_s1 + $0x10] sm:$0xff]  ;;  %v250_v32 = vld [vmem:[%s1502_s1 + $0x88] sm:$0xff] }
  0x16   : > { %889 = vmatprep.subr.mxu0 %v259_v10  ;;  %v234_v33 = vld [vmem:[%s1502_s1 + $0x8] sm:$0xff]  ;;  %v249_v34 = vld [vmem:[%s1502_s1 + $0x80] sm:$0xff]  ;;  %v1215_v37 = vld [vmem:[%s1149_s29 + $0x1f8] sm:$0xff] }
  0x17   : > { %890 = vmatpush3.msra.mxu0 %v243_v11  ;;  %v233_v35 = vld [vmem:[%s1502_s1] sm:$0xff]  ;;  %v228_v38 = vld [vmem:[%s1501_s0 + $0x18] sm:$0xff]  ;;  %v227_v40 = vld [vmem:[%s1501_s0 + $0x10] sm:$0xff] }
  0x18   : > { %891 = vmatprep.subr.mxu0 %v258_v12  ;;  %v225_v36 = vld [vmem:[%s1501_s0] sm:$0xff]  ;;  %v1221_v39 = vld [vmem:[%s1149_s29 + $0x178] sm:$0xff]  ;;  %v230_v41 = vld [vmem:[%s1501_s0 + $0x28] sm:$0xff] }
  0x19   : > { %892 = vmatpush3.msra.mxu0 %v242_v14  ;;  %v229_v42 = vld [vmem:[%s1501_s0 + $0x20] sm:$0xff]  ;;  %v232_v43 = vld [vmem:[%s1501_s0 + $0x38] sm:$0xff]  ;;  %v231_v44 = vld [vmem:[%s1501_s0 + $0x30] sm:$0xff] }
  0x1a   : > { %893 = vmatprep.subr.mxu0 %v257_v15  ;;  %v476_v45 = vld [vmem:[%s1149_s29 + $0x70] sm:$0xff]  ;;  %v491_v47 = vld [vmem:[%s1149_s29 + $0xe8] sm:$0xff]  ;;  %v490_v51 = vld [vmem:[%s1149_s29 + $0xe0] sm:$0xff] }
  0x1b   : > { %894 = vmatpush3.msra.mxu0 %v241_v16  ;;  %v1242_v46 = vld [vmem:[%s1149_s29 + $0x1f0] sm:$0xff]  ;;  %926 = vmatpush3.msra.mxu1 %v476_v45  ;;  %v475_v49 = vld [vmem:[%s1149_s29 + $0x68] sm:$0xff]  ;;  %v474_v53 = vld [vmem:[%s1149_s29 + $0x60] sm:$0xff] }
  0x1c   : > { %895 = vmatprep.subr.mxu0 %v256_v19  ;;  %v1247_v48 = vld [vmem:[%s1149_s29 + $0x170] sm:$0xff]  ;;  %927 = vmatprep.subr.mxu1 %v491_v47  ;;  %v1252_v50 = vld [vmem:[%s1149_s29 + $0x1e8] sm:$0xff]  ;;  %v1262_v54 = vld [vmem:[%s1149_s29 + $0x1e0] sm:$0xff] }
  0x1d   : > { %896 = vmatpush3.msra.mxu0 %v240_v21  ;;  %928 = vmatpush3.msra.mxu1 %v475_v49  ;;  %v1257_v52 = vld [vmem:[%s1149_s29 + $0x168] sm:$0xff]  ;;  %v489_v55 = vld [vmem:[%s1149_s29 + $0xd8] sm:$0xff]  ;;  %v1267_v56 = vld [vmem:[%s1149_s29 + $0x160] sm:$0xff] }
  0x1e   : > { %897 = vmatprep.subr.mxu0 %v255_v22  ;;  %929 = vmatprep.subr.mxu1 %v490_v51  ;;  %v473_v57 = vld [vmem:[%s1149_s29 + $0x58] sm:$0xff]  ;;  %v488_v59 = vld [vmem:[%s1149_s29 + $0xd0] sm:$0xff]  ;;  %v487_v63 = vld [vmem:[%s1149_s29 + $0xc8] sm:$0xff] }
  0x1f   : > { %898 = vmatpush3.msra.mxu0 %v239_v23  ;;  %930 = vmatpush3.msra.mxu1 %v474_v53  ;;  %v1272_v58 = vld [vmem:[%s1149_s29 + $0x1d8] sm:$0xff]  ;;  %v472_v61 = vld [vmem:[%s1149_s29 + $0x50] sm:$0xff]  ;;  %v471_v1 = vld [vmem:[%s1149_s29 + $0x48] sm:$0xff]  ;;  %v377_v53 = vlaneseq }
  0x20   : > { %899 = vmatprep.subr.mxu0 %v254_v24  ;;  %931 = vmatprep.subr.mxu1 %v489_v55  ;;  %v1277_v60 = vld [vmem:[%s1149_s29 + $0x158] sm:$0xff]  ;;  %v1282_v62 = vld [vmem:[%s1149_s29 + $0x1d0] sm:$0xff]  ;;  %v1292_v2 = vld [vmem:[%s1149_s29 + $0x1c8] sm:$0xff] }
  0x21   : > { %900 = vmatpush3.msra.mxu0 %v238_v25  ;;  %932 = vmatpush3.msra.mxu1 %v473_v57  ;;  %v1287_v0 = vld [vmem:[%s1149_s29 + $0x150] sm:$0xff]  ;;  %v486_v3 = vld [vmem:[%s1149_s29 + $0xc0] sm:$0xff]  ;;  %v1297_v4 = vld [vmem:[%s1149_s29 + $0x148] sm:$0xff] }
  0x22   : > { %901 = vmatprep.subr.mxu0 %v253_v26  ;;  %933 = vmatprep.subr.mxu1 %v488_v59  ;;  %v470_v5 = vld [vmem:[%s1149_s29 + $0x40] sm:$0xff]  ;;  %v485_v7 = vld [vmem:[%s1149_s29 + $0xb8] sm:$0xff]  ;;  %v484_v11 = vld [vmem:[%s1149_s29 + $0xb0] sm:$0xff] }
  0x23   : > { %902 = vmatpush3.msra.mxu0 %v237_v27  ;;  %934 = vmatpush3.msra.mxu1 %v472_v61  ;;  %v1302_v6 = vld [vmem:[%s1149_s29 + $0x1c0] sm:$0xff]  ;;  %v469_v9 = vld [vmem:[%s1149_s29 + $0x38] sm:$0xff]  ;;  %v468_v13 = vld [vmem:[%s1149_s29 + $0x30] sm:$0xff] }
  0x24   : > { %903 = vmatprep.subr.mxu0 %v252_v28  ;;  %935 = vmatprep.subr.mxu1 %v487_v63  ;;  %v1307_v8 = vld [vmem:[%s1149_s29 + $0x140] sm:$0xff]  ;;  %v1312_v10 = vld [vmem:[%s1149_s29 + $0x1b8] sm:$0xff]  ;;  %v1322_v14 = vld [vmem:[%s1149_s29 + $0x1b0] sm:$0xff]  ;;  %v378_v63 = vshrl.u32 %v377_v53, 7 }
  0x25   : > { %904 = vmatpush3.msra.mxu0 %v236_v29  ;;  %936 = vmatpush3.msra.mxu1 %v471_v1  ;;  %v1317_v12 = vld [vmem:[%s1149_s29 + $0x138] sm:$0xff]  ;;  %v483_v15 = vld [vmem:[%s1149_s29 + $0xa8] sm:$0xff]  ;;  %v1327_v16 = vld [vmem:[%s1149_s29 + $0x130] sm:$0xff] }
  0x26   : > { %905 = vmatprep.subr.mxu0 %v251_v30  ;;  %937 = vmatprep.subr.mxu1 %v486_v3  ;;  %v467_v17 = vld [vmem:[%s1149_s29 + $0x28] sm:$0xff]  ;;  %v482_v19 = vld [vmem:[%s1149_s29 + $0xa0] sm:$0xff]  ;;  %v481_v23 = vld [vmem:[%s1149_s29 + $0x98] sm:$0xff] }
  0x27   : > { %906 = vmatpush3.msra.mxu0 %v235_v31  ;;  %938 = vmatpush3.msra.mxu1 %v470_v5  ;;  %v1332_v18 = vld [vmem:[%s1149_s29 + $0x1a8] sm:$0xff]  ;;  %v466_v21 = vld [vmem:[%s1149_s29 + $0x20] sm:$0xff]  ;;  %v465_v25 = vld [vmem:[%s1149_s29 + $0x18] sm:$0xff] }
  0x28   : > { %907 = vmatprep.subr.mxu0 %v250_v32  ;;  %939 = vmatprep.subr.mxu1 %v485_v7  ;;  %v1337_v20 = vld [vmem:[%s1149_s29 + $0x128] sm:$0xff]  ;;  %v1342_v22 = vld [vmem:[%s1149_s29 + $0x1a0] sm:$0xff]  ;;  %v1352_v26 = vld [vmem:[%s1149_s29 + $0x198] sm:$0xff] }
  0x29   : > { %908 = vmatpush3.msra.mxu0 %v234_v33  ;;  %940 = vmatpush3.msra.mxu1 %v469_v9  ;;  %v1347_v24 = vld [vmem:[%s1149_s29 + $0x120] sm:$0xff]  ;;  %v480_v27 = vld [vmem:[%s1149_s29 + $0x90] sm:$0xff]  ;;  %v1357_v28 = vld [vmem:[%s1149_s29 + $0x118] sm:$0xff] }
  0x2a   : > { %909 = vmatprep.subr.mxu0 %v249_v34  ;;  %941 = vmatprep.subr.mxu1 %v484_v11  ;;  %v464_v29 = vld [vmem:[%s1149_s29 + $0x10] sm:$0xff]  ;;  %v479_v31 = vld [vmem:[%s1149_s29 + $0x88] sm:$0xff]  ;;  %v379_v11 = vadd.s32 8, %v378_v63 }
  0x2b   : > { %910 = vmatpush3.msra.mxu0 %v233_v35  ;;  %942 = vmatpush3.msra.mxu1 %v468_v13  ;;  %v1361_v30 = vld [vmem:[%s1149_s29 + $0x190] sm:$0xff]  ;;  %v463_v33 = vld [vmem:[%s1149_s29 + $0x8] sm:$0xff]  ;;  %v478_v35 = vld [vmem:[%s1149_s29 + $0x80] sm:$0xff] }
  0x2c   : > { %337 = vmatmul.mubr.f32.vlgmr.msra.gmra.mxu0 %v225_v36  ;;  %967 = vmatprep.subr.mxu0 %v1215_v37  ;;  %v1366_v32 = vld [vmem:[%s1149_s29 + $0x110] sm:$0xff]  ;;  %v1371_v34 = vld [vmem:[%s1149_s29 + $0x188] sm:$0xff] }
  0x2d   : > { %341 = vmatprep.mubr.f32.mxu0 %v228_v38  ;;  %968 = vmatpush3.msra.mxu0 %v1221_v39  ;;  %v1375_v36 = vld [vmem:[%s1149_s29 + $0x108] sm:$0xff]  ;;  %v462_v38 = vld [vmem:[%s1149_s29] sm:$0xff] }
  0x2e   : > { %969 = vmatprep.subr.mxu0 %v1242_v46  ;;  %943 = vmatprep.subr.mxu1 %v483_v15 }
  0x2f   : > { %970 = vmatpush3.msra.mxu0 %v1247_v48  ;;  %944 = vmatpush3.msra.mxu1 %v467_v17 }
  0x30   : > { %342 = vmatmul.mubr.f32.gmra.mxu0 %v227_v40  ;;  %971 = vmatprep.subr.mxu0 %v1252_v50  ;;  %v1380_v40 = vld [vmem:[%s1149_s29 + $0x180] sm:$0xff] }
  0x31   : > { %346 = vmatprep.mubr.f32.mxu0 %v230_v41  ;;  %972 = vmatpush3.msra.mxu0 %v1257_v52  ;;  %v1386_v41 = vld [vmem:[%s1149_s29 + $0x100] sm:$0xff]  ;;  %s435_s29 = scalar_select %p430_p4, 1, 0 }
  0x32   : > { %973 = vmatprep.subr.mxu0 %v1262_v54  ;;  %945 = vmatprep.subr.mxu1 %v482_v19  ;;  %v386_v19 = vand.u32 15, %v378_v63 }
  0x33   : > { %974 = vmatpush3.msra.mxu0 %v1267_v56  ;;  %946 = vmatpush3.msra.mxu1 %v466_v21  ;;  %v436_v21 = vstv %s435_s29 }
  0x34   : > { %347 = vmatmul.mubr.f32.gmra.mxu0 %v229_v42  ;;  %975 = vmatprep.subr.mxu0 %v1272_v58  ;;  %vm431_vm0 = vcmp.eq.s32.totalorder %v386_v19, 0  ;;  %vm1395_vm1 = vcmp.eq.s32.totalorder %v436_v21, 1 }
  0x35   : > { %351 = vmatprep.mubr.f32.mxu0 %v232_v43  ;;  %976 = vmatpush3.msra.mxu0 %v1277_v60  ;;  %v796_v43 = vld [vmem:[%s1503_s2] ss:$0 sm:$0xff]  ;;  %vm438_vm4 = vmand %vm1395_vm1, %vm431_vm0 }
  0x36   : > { %977 = vmatprep.subr.mxu0 %v1282_v62  ;;  %947 = vmatprep.subr.mxu1 %v481_v23  ;;  %v393_v23 = vand.u32 15, %v379_v11  ;;  %vm808_vm6 = vmneg %vm438_vm4 }
  0x37   : > { %978 = vmatpush3.msra.mxu0 %v1287_v0  ;;  %948 = vmatpush3.msra.mxu1 %v465_v25 }
  0x38   : > { %352 = vmatmul.mubr.f32.gmra.mxu0 %v231_v44  ;;  %979 = vmatprep.subr.mxu0 %v1292_v2  ;;  %vm448_vm2 = vcmp.eq.s32.totalorder %v393_v23, 15 }
  0x39   : > { %980 = vmatpush3.msra.mxu0 %v1297_v4  ;;  %949 = vmatprep.subr.mxu1 %v480_v27  ;;  %v452_v27 = vstv %s451_s20 }
  0x3a   : > { %981 = vmatprep.subr.mxu0 %v1302_v6  ;;  %950 = vmatpush3.msra.mxu1 %v464_v29  ;;  %vm1399_vm3 = vcmp.eq.s32.totalorder %v452_v27, 1 }
  0x3b   : > { %982 = vmatpush3.msra.mxu0 %v1307_v8  ;;  %951 = vmatprep.subr.mxu1 %v479_v31  ;;  %v380_v31 = vadd.s32 16, %v378_v63  ;;  %vm455_vm5 = vmand %vm1399_vm3, %vm448_vm2 }
  0x3c   : > { %983 = vmatprep.subr.mxu0 %v1312_v10  ;;  %952 = vmatpush3.msra.mxu1 %v463_v33  ;;  %vm810_vm7 = vmneg %vm455_vm5 }
  0x3d   : > { %984 = vmatpush3.msra.mxu0 %v1317_v12  ;;  %953 = vmatprep.subr.mxu1 %v478_v35  ;;  %v381_v35 = vadd.s32 24, %v378_v63 }
  0x3e   : > { %985 = vmatprep.subr.mxu0 %v1322_v14  ;;  %954 = vmatpush3.msra.mxu1 %v462_v38  ;;  %v400_v38 = vand.u32 15, %v380_v31 }
  0x3f   : > { %986 = vmatpush3.msra.mxu0 %v1327_v16  ;;  %1011 = vmatprep.subr.mxu1 %v1215_v37 }
  0x40   : > { %987 = vmatprep.subr.mxu0 %v1332_v18  ;;  %vm1412_vm8 = vcmp.eq.s32.totalorder %v400_v38, 0 }
  0x41   : > { %988 = vmatpush3.msra.mxu0 %v1337_v20  ;;  %vm440_vm10 = vmand %vm1395_vm1, %vm1412_vm8 }
  0x42   : > { %989 = vmatprep.subr.mxu0 %v1342_v22  ;;  %vm1436_vm12 = vmneg %vm440_vm10 }
  0x43   : > { %990 = vmatpush3.msra.mxu0 %v1347_v24 }
  0x44   : > { %991 = vmatprep.subr.mxu0 %v1352_v26 }
  0x45   : > { %992 = vmatpush3.msra.mxu0 %v1357_v28 }
  0x46   : > { %993 = vmatprep.subr.mxu0 %v1361_v30 }
  0x47   : > { %994 = vmatpush3.msra.mxu0 %v1366_v32 }
  0x48   : > { %995 = vmatprep.subr.mxu0 %v1371_v34 }
  0x49   : > { %996 = vmatpush3.msra.mxu0 %v1375_v36 }
  0x4a   : > { %997 = vmatprep.subr.mxu0 %v1380_v40 }
  0x4b   : > { %998 = vmatpush3.msra.mxu0 %v1386_v41 }
  0xec   : > { %v911_v42 = vpop.f32.mrf.mxu0 }
  0xee   : > { %v912_v44 = vpop.f32.mrf.mxu0 }
  0xef   : > { %v913_v45 = vadd.f32 %v912_v44, %v911_v42  ;;  %v407_v42 = vand.u32 15, %v381_v35 }
  0xf0   : > { %v914_v47 = vpop.f32.mrf.mxu0 }
  0xf1   : > { %v339_v49 = vadd.f32 %v913_v45, %v796_v43  ;;  %vm1417_vm9 = vcmp.eq.s32.totalorder %v407_v42, 15 }
  0xf2   : > { %v915_v51 = vpop.f32.mrf.mxu0  ;;  %vm457_vm11 = vmand %vm1399_vm3, %vm1417_vm9 }
  0xf3   : > { %v357_v55 = vmax.f32 %v339_v49, 0.0  ;;  %v916_v57 = vadd.f32 %v915_v51, %v914_v47  ;;  %vm1441_vm13 = vmneg %vm457_vm11 }
  0xf4   : > { %v917_v59 = vpop.f32.mrf.mxu0 }
  0xf5   : > { %361 = vst [vmem:[#allocation2 + $0x8] sm:$0xff] %v357_v55  ;;  %v344_v37 = vadd.f32 %v916_v57, %v796_v43 }
  0xf6   : > { %v918_v61 = vpop.f32.mrf.mxu0 }
  0xf7   : > { %v358_v1 = vmax.f32 %v344_v37, 0.0  ;;  %v919_v3 = vadd.f32 %v918_v61, %v917_v59 }
  0xf8   : > { %v920_v5 = vpop.f32.mrf.mxu0 }
  0xf9   : > { %362 = vst [vmem:[#allocation2 + $0x10] sm:$0xff] %v358_v1  ;;  %v349_v7 = vadd.f32 %v919_v3, %v796_v43 }
  0xfa   : > { %v921_v9 = vpop.f32.mrf.mxu0 }
  0xfb   : > { %v359_v13 = vmax.f32 %v349_v7, 0.0  ;;  %v922_v15 = vadd.f32 %v921_v9, %v920_v5 }
  0xfd   : > { %363 = vst [vmem:[#allocation2 + $0x18] sm:$0xff] %v359_v13  ;;  %v354_v17 = vadd.f32 %v922_v15, %v796_v43 }
  0xff   : > { %v360_v25 = vmax.f32 %v354_v17, 0.0 }
 0x101   : > { %364 = vst [vmem:[#allocation2 + $0x20] sm:$0xff] %v360_v25 }
 0x108   : > { %v875_v43 = vld [vmem:[%s1408_s19 + $0x7] sm:$0xff]  ;;  %v876_v47 = vld [vmem:[%s1408_s19 + $0xf] sm:$0xff] }
 0x109   : > { %v868_v44 = vld [vmem:[%s1408_s19 + $0x6] sm:$0xff]  ;;  %565 = vmatprep.mubr.f32.mxu1 %v875_v43  ;;  %698 = vmatprep.mubr.f32.mxu0 %v875_v43  ;;  %v869_v51 = vld [vmem:[%s1408_s19 + $0xe] sm:$0xff] }
 0x10a   : > { %809 = vmatmul.mubr.msk.f32.vlgmr.msra.gmra.mxu1 %vm808_vm6, %v868_v44  ;;  %850 = vmatmul.mubr.msk.f32.vlgmr.msra.gmra.mxu0 %vm808_vm6, %v868_v44 }
 0x10b   : > { %1027 = vmatpush3.msra.mxu1 %v1221_v39  ;;  %811 = vmatprep.mubr.msk.f32.mxu1 %vm810_vm7, %v876_v47  ;;  %v877_v39 = vld [vmem:[%s1408_s19 + $0x17] sm:$0xff] }
 0x10c   : > { %1012 = vmatprep.subr.mxu1 %v1242_v46  ;;  %852 = vmatprep.mubr.msk.f32.mxu0 %vm810_vm7, %v876_v47 }
 0x10d   : > { %1028 = vmatpush3.msra.mxu1 %v1247_v48 }
 0x10e   : > { %1013 = vmatprep.subr.mxu1 %v1252_v50  ;;  %571 = vmatmul.mubr.f32.gmra.mxu1 %v869_v51  ;;  %v870_v50 = vld [vmem:[%s1408_s19 + $0x16] sm:$0xff] }
 0x10f   : > { %1029 = vmatpush3.msra.mxu1 %v1257_v52  ;;  %704 = vmatmul.mubr.f32.gmra.mxu0 %v869_v51  ;;  %v878_v52 = vld [vmem:[%s1408_s19 + $0x1f] sm:$0xff] }
 0x110   : > { %575 = vmatprep.mubr.f32.mxu1 %v877_v39  ;;  %1014 = vmatprep.subr.mxu1 %v1262_v54  ;;  %v871_v54 = vld [vmem:[%s1408_s19 + $0x1e] sm:$0xff] }
 0x111   : > { %1030 = vmatpush3.msra.mxu1 %v1267_v56 }
 0x112   : > { %1015 = vmatprep.subr.mxu1 %v1272_v58  ;;  %813 = vmatmul.mubr.msk.f32.gmra.mxu1 %vm1436_vm12, %v870_v50 }
 0x113   : > { %1031 = vmatpush3.msra.mxu1 %v1277_v60  ;;  %815 = vmatprep.mubr.msk.f32.mxu1 %vm1441_vm13, %v878_v52  ;;  %v807_v60 = vld [vmem:[%s1505_s4] ss:$0 sm:$0xff] }
 0x114   : > { %1016 = vmatprep.subr.mxu1 %v1282_v62 }
 0x115   : > { %1032 = vmatpush3.msra.mxu1 %v1287_v0 }
 0x116   : > { %1017 = vmatprep.subr.mxu1 %v1292_v2  ;;  %581 = vmatmul.mubr.f32.gmra.mxu1 %v871_v54 }
 0x117   : > { %1033 = vmatpush3.msra.mxu1 %v1297_v4  ;;  %708 = vmatprep.mubr.f32.mxu1 %v877_v39 }
 0x118   : > { %1018 = vmatprep.subr.mxu1 %v1302_v6 }
 0x119   : > { %1034 = vmatpush3.msra.mxu1 %v1307_v8 }
 0x11a   : > { %1019 = vmatprep.subr.mxu1 %v1312_v10 }
 0x11b   : > { %1035 = vmatpush3.msra.mxu1 %v1317_v12 }
 0x11c   : > { %1020 = vmatprep.subr.mxu1 %v1322_v14 }
 0x11d   : > { %1036 = vmatpush3.msra.mxu1 %v1327_v16 }
 0x11e   : > { %1021 = vmatprep.subr.mxu1 %v1332_v18 }
 0x11f   : > { %1037 = vmatpush3.msra.mxu1 %v1337_v20 }
 0x120   : > { %1022 = vmatprep.subr.mxu1 %v1342_v22 }
 0x121   : > { %1038 = vmatpush3.msra.mxu1 %v1347_v24 }
 0x122   : > { %1023 = vmatprep.subr.mxu1 %v1352_v26 }
 0x123   : > { %1039 = vmatpush3.msra.mxu1 %v1357_v28 }
 0x124   : > { %1024 = vmatprep.subr.mxu1 %v1361_v30 }
 0x125   : > { %1040 = vmatpush3.msra.mxu1 %v1366_v32 }
 0x126   : > { %1025 = vmatprep.subr.mxu1 %v1371_v34 }
 0x127   : > { %1041 = vmatpush3.msra.mxu1 %v1375_v36 }
 0x128   : > { %1026 = vmatprep.subr.mxu1 %v1380_v40 }
 0x129   : > { %1042 = vmatpush3.msra.mxu1 %v1386_v41 }
 0x12a   : > { %854 = vmatmul.mubr.msk.f32.vlgmr.msra.gmra.mxu1 %vm1436_vm12, %v870_v50 }
 0x12b   : > { %856 = vmatprep.mubr.msk.f32.mxu1 %vm1441_vm13, %v878_v52 }
 0x12e   : > { %714 = vmatmul.mubr.f32.gmra.mxu1 %v871_v54 }
 0x1ca   : > { %v955_v56 = vpop.f32.mrf.mxu1  ;;  %v999_v58 = vpop.f32.mrf.mxu0 }
 0x1cc   : > { %v956_v62 = vpop.f32.mrf.mxu1  ;;  %v1000_v0 = vpop.f32.mrf.mxu0 }
 0x1cd   : > { %v957_v2 = vadd.f32 %v956_v62, %v955_v56  ;;  %v1001_v4 = vadd.f32 %v1000_v0, %v999_v58 }
 0x1ce   : > { %v958_v6 = vpop.f32.mrf.mxu1 }
 0x1cf   : > { %v568_v8 = vadd.f32 %v957_v2, %v807_v60  ;;  %v701_v10 = vadd.f32 %v1001_v4, %v807_v60  ;;  %v1002_v12 = vpop.f32.mrf.mxu0 }
 0x1d0   : > { %v959_v14 = vpop.f32.mrf.mxu1 }
 0x1d1   : > { %v586_v16 = vmax.f32 %v568_v8, 0.0  ;;  %v719_v18 = vmax.f32 %v701_v10, 0.0  ;;  %v960_v20 = vadd.f32 %v959_v14, %v958_v6  ;;  %v1003_v22 = vpop.f32.mrf.mxu0 }
 0x1d2   : > { %v1004_v24 = vadd.f32 %v1003_v22, %v1002_v12  ;;  %v961_v26 = vpop.f32.mrf.mxu1 }
 0x1d3   : > { %590 = vst [vmem:[%s1488_s26] sm:$0xff] %v586_v16  ;;  %857 = vst [vmem:[%s1488_s26 + $0x20] sm:$0xff] %v719_v18  ;;  %v573_v28 = vadd.f32 %v960_v20, %v807_v60 }
 0x1d4   : > { %v706_v30 = vadd.f32 %v1004_v24, %v807_v60  ;;  %v962_v32 = vpop.f32.mrf.mxu1 }
 0x1d5   : > { %v587_v34 = vmax.f32 %v573_v28, 0.0  ;;  %v963_v36 = vadd.f32 %v962_v32, %v961_v26 }
 0x1d6   : > { %v720_v40 = vmax.f32 %v706_v30, 0.0  ;;  %v964_v41 = vpop.f32.mrf.mxu1 }
 0x1d7   : > { %591 = vst [vmem:[%s1488_s26 + $0x8] sm:$0xff] %v587_v34  ;;  %v578_v53 = vadd.f32 %v963_v36, %v807_v60 }
 0x1d8   : > { %858 = vst [vmem:[%s1488_s26 + $0x28] sm:$0xff] %v720_v40  ;;  %v965_v55 = vpop.f32.mrf.mxu1 }
 0x1d9   : > { %v588_v57 = vmax.f32 %v578_v53, 0.0  ;;  %v966_v59 = vadd.f32 %v965_v55, %v964_v41 }
 0x1db   : > { %592 = vst [vmem:[%s1488_s26 + $0x10] sm:$0xff] %v588_v57  ;;  %v583_v37 = vadd.f32 %v966_v59, %v807_v60 }
 0x1dd   : > { %v589_v61 = vmax.f32 %v583_v37, 0.0 }
 0x1df   : > { %593 = vst [vmem:[%s1488_s26 + $0x18] sm:$0xff] %v589_v61 }
 0x1ea   : > { %v1005_v63 = vpop.f32.mrf.mxu1 }
 0x1ec   : > { %v1006_v1 = vpop.f32.mrf.mxu1 }
 0x1ed   : > { %v1007_v3 = vadd.f32 %v1006_v1, %v1005_v63 }
 0x1ee   : > { %v1008_v5 = vpop.f32.mrf.mxu1 }
 0x1ef   : > { %v711_v7 = vadd.f32 %v1007_v3, %v807_v60 }
 0x1f0   : > { %v1009_v9 = vpop.f32.mrf.mxu1 }
 0x1f1   : > { %v721_v11 = vmax.f32 %v711_v7, 0.0  ;;  %v1010_v13 = vadd.f32 %v1009_v9, %v1008_v5 }
 0x1f3   : > { %859 = vst [vmem:[%s1488_s26 + $0x30] sm:$0xff] %v721_v11  ;;  %v716_v15 = vadd.f32 %v1010_v13, %v807_v60 }
 0x1f5   : > { %v722_v17 = vmax.f32 %v716_v15, 0.0 }
 0x1f7   : > { %860 = vst [vmem:[%s1488_s26 + $0x38] sm:$0xff] %v722_v17 }
 0x1f8 PF: > { %s15_s18 = sadd.s32 1, %s1057_s18  }
 0x1f9   : > { %p12_p6 = scmp.ge.s32.totalorder %s15_s18, 4  }
 0x1fb   :  { %14 = sbr.rel (!%p12_p6) target bundleno = 1 (0x1), region = 74 }

</bundles_post_ra>
